<compile_context>
chip_gen: v7x
topology: tpu7x:2x2x1
jax: 0.10.0
libtpu: 0.0.40
codegen_flags: <defaults>
</compile_context>

<pallas_src>
import functools

import jax
import jax.numpy as jnp
from jax.experimental import pallas as pl
from jax.experimental.pallas import tpu as pltpu


class hp:
    # Hyperparameters the original module reads from a global `hp`.
    duration_loss_norm = 0.1
    guide_f0_with_voiced_targets = True  # masked_fill in reference is not in-place -> no effect


def _round_up(x, m):
    return ((x + m - 1) // m) * m


def _cdiv(a, b):
    return -(-a // b)


def _vmem_capacity_bytes():
    """Best-effort per-TensorCore VMEM capacity; conservative 64 MiB fallback (v7x)."""
    try:
        info = pltpu.get_tpu_info()
        for attr in ("vmem_capacity_bytes", "vmem_size_bytes", "vmem_bytes"):
            v = getattr(info, attr, None)
            if v:
                return int(v)
    except Exception:
        pass
    return 64 * 1024 * 1024


def _log1p_accurate(z):
    # log(1 + z) for z in [0, 1] with the Kahan correction.  Uses only ops with
    # guaranteed Mosaic lowerings (log / div / where) and matches log1p to ~1 ulp,
    # avoiding the underflow-to-0 bias of a naive log(1 + z) for large |x|.
    # NOTE: relies on `w = 1+z; d = w-1` not being algebraically simplified
    # (Mosaic preserves FP ordering); __main__ pins this against jnp.log1p.
    w = 1.0 + z
    d = w - 1.0
    safe_d = jnp.where(d == 0.0, 1.0, d)
    return jnp.where(d == 0.0, z, jnp.log(w) * (z / safe_d))


# ------------------ streamed mel kernel (HBM-bandwidth bound) ------------------

def _mel_sse_kernel(mel_ref, mel_post_ref, mel_tgt_ref, part_ref, *,
                    total_rows, tile_rows):
    i = pl.program_id(0)
    tgt = mel_tgt_ref[...].astype(jnp.float32)      # up-cast in-kernel (bf16-friendly)
    d0 = mel_ref[...].astype(jnp.float32) - tgt
    d1 = mel_post_ref[...].astype(jnp.float32) - tgt
    sq0 = d0 * d0
    sq1 = d1 * d1
    if total_rows % tile_rows != 0:
        # Ragged final tile: Pallas partial edge blocks are NOT zero-filled,
        # so mask rows past the true (compile-time) row count.
        r, c = sq0.shape
        row = i * tile_rows + jax.lax.broadcasted_iota(jnp.int32, (r, c), 0)
        valid = row < total_rows
        sq0 = jnp.where(valid, sq0, 0.0)
        sq1 = jnp.where(valid, sq1, 0.0)
    s0 = jnp.sum(sq0)
    s1 = jnp.sum(sq1)
    # One lane-dense (1, 8, 128) partial block per tile: mel SSE at lane 0,
    # postnet SSE at lane 1 -> a single output DMA per grid step.
    lane = jax.lax.broadcasted_iota(jnp.int32, part_ref.shape, 2)
    part_ref[...] = jnp.where(lane == 0, s0, jnp.where(lane == 1, s1, 0.0))


def _mel_losses(mel2, mel_post2, mel_tgt2):
    R, M = mel2.shape
    itemsize = max(a.dtype.itemsize for a in (mel2, mel_post2, mel_tgt2))
    bytes_per_row = M * itemsize

    # Per-generation tile byte budget (per input, per pipeline buffer).
    vmem = _vmem_capacity_bytes()
    if vmem >= 96 * 1024 * 1024:              # v5e / v6e: 128 MiB VMEM
        tile_budget = 8 * 1024 * 1024         # 3 inputs x 2 bufs x 8 MiB = 48 MiB
        vmem_limit = 100 * 1024 * 1024
    else:                                     # v7x: 64 MiB per TensorCore
        tile_budget = 4 * 1024 * 1024         # 3 inputs x 2 bufs x 4 MiB = 24 MiB
        vmem_limit = 48 * 1024 * 1024

    num_tiles = max(1, _cdiv(R * bytes_per_row, tile_budget))
    if num_tiles > 1:
        num_tiles = _round_up(num_tiles, 2)   # even split over v7x's 2 TensorCores
        tile_r = max(8, _round_up(_cdiv(R, num_tiles), 8))
        num_tiles = _cdiv(R, tile_r)
    else:
        tile_r = R                            # full-dim block: exempt from 8-divisibility

    mel_spec = pl.BlockSpec((tile_r, M), lambda i: (i, 0))
    part_spec = pl.BlockSpec((1, 8, 128), lambda i: (i, 0, 0))

    cost = pl.CostEstimate(
        flops=int(6 * R * M),
        transcendentals=0,
        bytes_accessed=int(3 * R * M * itemsize + num_tiles * 8 * 128 * 4))

    parts = pl.pallas_call(
        functools.partial(_mel_sse_kernel, total_rows=R, tile_rows=tile_r),
        grid=(num_tiles,),
        out_shape=jax.ShapeDtypeStruct((num_tiles, 8, 128), jnp.float32),
        in_specs=[mel_spec, mel_spec, mel_spec],
        out_specs=part_spec,
        compiler_params=pltpu.CompilerParams(
            dimension_semantics=("parallel",),   # per-tile output blocks -> race-free
            vmem_limit_bytes=vmem_limit),
        cost_estimate=cost,
    )(mel2, mel_post2, mel_tgt2)

    n_mel = R * M
    mel_loss = jnp.sum(parts[:, 0, 0]) / n_mel
    mel_post_loss = jnp.sum(parts[:, 0, 1]) / n_mel
    return mel_loss, mel_post_loss


# ---------------- one-shot kernel for the tiny O(B*T) loss terms ----------------

def _small_terms_kernel(dur_p_ref, dur_t_ref, f0_p_ref, f0_t_ref,
                        v_p_ref, v_t_ref, out_ref):
    # MSE(pred * norm, tgt * norm) on durations.
    dur_d = (dur_p_ref[...].astype(jnp.float32)
             - dur_t_ref[...].astype(jnp.float32)) * hp.duration_loss_norm
    dur_sse = jnp.sum(dur_d * dur_d)

    # MSE on f0.
    f0_d = f0_p_ref[...].astype(jnp.float32) - f0_t_ref[...].astype(jnp.float32)
    f0_sse = jnp.sum(f0_d * f0_d)

    # Numerically-stable BCEWithLogits: max(x, 0) - x*y + log1p(exp(-|x|)).
    x = v_p_ref[...].astype(jnp.float32)
    y = v_t_ref[...].astype(jnp.float32)
    bce = jnp.maximum(x, 0.0) - x * y + _log1p_accurate(jnp.exp(-jnp.abs(x)))
    bce_sum = jnp.sum(bce)

    lane = jax.lax.broadcasted_iota(jnp.int32, out_ref.shape, 1)
    out_ref[...] = (jnp.where(lane == 0, dur_sse, 0.0)
                    + jnp.where(lane == 1, f0_sse, 0.0)
                    + jnp.where(lane == 2, bce_sum, 0.0))


def _small_losses(dur_p, dur_t, f0_p, f0_t, v_p, v_t):
    dur_t = dur_t.astype(jnp.float32)   # .float() in the reference
    v_t = v_t.astype(jnp.float32)       # .float() in the reference
    out = pl.pallas_call(
        _small_terms_kernel,
        out_shape=jax.ShapeDtypeStruct((8, 128), jnp.float32),
    )(dur_p, dur_t, f0_p, f0_t, v_p, v_t)
    dur_loss = out[0, 0] / dur_p.size
    f0_loss = out[0, 1] / f0_p.size
    voiced_loss = out[0, 2] / v_p.size
    return dur_loss, f0_loss, voiced_loss


# --------------------------------- public API ---------------------------------

def dnn_loss(mel, mel_postnet, duration_predicted, f0_predicted, voiced_predicted,
             mel_target, duration_predictor_target, f0_target, voiced_target):
    # Length matching exactly as in the PyTorch forward (crop whichever side is longer).
    T = min(mel.shape[1], mel_target.shape[1])
    mel = mel[:, :T]
    mel_postnet = mel_postnet[:, :T]
    f0_predicted = f0_predicted[:, :T]
    voiced_predicted = voiced_predicted[:, :T]
    mel_target = mel_target[:, :T]
    f0_target = f0_target[:, :T]
    voiced_target = voiced_target[:, :T]

    B, _, M = mel.shape
    R = B * T
    # Free, contiguous reshape to a lane-dense (rows, M) view -- no pad, no copy.
    mel2 = mel.reshape(R, M)
    mel_post2 = mel_postnet.reshape(R, M)
    mel_tgt2 = mel_target.reshape(R, M)

    mel_loss, mel_post_loss = _mel_losses(mel2, mel_post2, mel_tgt2)
    dur_loss, f0_loss, voiced_loss = _small_losses(
        duration_predicted, duration_predictor_target,
        f0_predicted, f0_target, voiced_predicted, voiced_target)
    return mel_loss, mel_post_loss, dur_loss, f0_loss, voiced_loss


def _reference(mel, mel_postnet, dur_p, f0_p, v_p, mel_t, dur_t, f0_t, v_t):
    T = min(mel.shape[1], mel_t.shape[1])
    mel, mel_postnet = mel[:, :T], mel_postnet[:, :T]
    f0_p, v_p = f0_p[:, :T], v_p[:, :T]
    mel_t, f0_t, v_t = mel_t[:, :T], f0_t[:, :T], v_t[:, :T]
    mse = lambda a, b: jnp.mean((a - b) ** 2)
    x = v_p.astype(jnp.float32)
    y = v_t.astype(jnp.float32)
    bce = jnp.mean(jnp.maximum(x, 0.0) - x * y + jnp.log1p(jnp.exp(-jnp.abs(x))))
    return (mse(mel, mel_t),
            mse(mel_postnet, mel_t),
            mse(dur_p * hp.duration_loss_norm, dur_t.astype(jnp.float32) * hp.duration_loss_norm),
            mse(f0_p, f0_t),
            bce)


if __name__ == "__main__":
    key = jax.random.PRNGKey(0)
    ks = jax.random.split(key, 9)
    B, T_pred, T_tgt, M, Td = 2, 18, 16, 32, 8   # prediction longer -> exercises the crop path

    mel = jax.random.normal(ks[0], (B, T_pred, M), jnp.float32)
    mel_postnet = jax.random.normal(ks[1], (B, T_pred, M), jnp.float32)
    mel_target = jax.random.normal(ks[2], (B, T_tgt, M), jnp.float32)
    duration_predicted = jax.random.normal(ks[3], (B, Td), jnp.float32)
    duration_predictor_target = jax.random.randint(ks[4], (B, Td), 0, 10)
    f0_predicted = jax.random.normal(ks[5], (B, T_pred), jnp.float32)
    f0_target = jax.random.normal(ks[6], (B, T_tgt), jnp.float32)
    voiced_predicted = jax.random.normal(ks[7], (B, T_pred), jnp.float32)
    voiced_target = jax.random.bernoulli(ks[8], 0.5, (B, T_tgt))

    losses = jax.jit(dnn_loss)(mel, mel_postnet, duration_predicted, f0_predicted,
                               voiced_predicted, mel_target, duration_predictor_target,
                               f0_target, voiced_target)
    losses = jax.block_until_ready(losses)

    ref = _reference(mel, mel_postnet, duration_predicted, f0_predicted,
                     voiced_predicted, mel_target, duration_predictor_target,
                     f0_target, voiced_target)
    for got, want in zip(losses, ref):
        assert jnp.allclose(got, want, rtol=1e-5, atol=1e-5), (got, want)

    print("KERNEL_OK")
</pallas_src>

<mosaic_0001>
module attributes {stable_mosaic.version = 11 : i64} {
  func.func @_mel_sse_kernel(%arg0: i32, %arg1: memref<32x32xf32, #tpu.memory_space<vmem>>, %arg2: memref<32x32xf32, #tpu.memory_space<vmem>>, %arg3: memref<32x32xf32, #tpu.memory_space<vmem>>, %arg4: memref<1x8x128xf32, #tpu.memory_space<vmem>>) attributes {dimension_semantics = [#tpu.dimension_semantics<parallel>], iteration_bounds = array<i64: 1>, scalar_prefetch = 0 : i64, scratch_operands = 0 : i64, tpu.core_type = #tpu.core_type<tc>, window_params = [{transform_indices = @transform_0, window_bounds = array<i64: 32, 32>}, {transform_indices = @transform_1, window_bounds = array<i64: 32, 32>}, {transform_indices = @transform_2, window_bounds = array<i64: 32, 32>}, {transform_indices = @transform_3, window_bounds = array<i64: 1, 8, 128>}]} {
    %c0 = arith.constant 0 : index
    %c0_0 = arith.constant 0 : index
    %0 = vector.load %arg3[%c0, %c0_0] : memref<32x32xf32, #tpu.memory_space<vmem>>, vector<32x32xf32>
    %c0_1 = arith.constant 0 : index
    %c0_2 = arith.constant 0 : index
    %1 = vector.load %arg1[%c0_1, %c0_2] : memref<32x32xf32, #tpu.memory_space<vmem>>, vector<32x32xf32>
    %2 = arith.subf %1, %0 : vector<32x32xf32>
    %c0_3 = arith.constant 0 : index
    %c0_4 = arith.constant 0 : index
    %3 = vector.load %arg2[%c0_3, %c0_4] : memref<32x32xf32, #tpu.memory_space<vmem>>, vector<32x32xf32>
    %4 = arith.subf %3, %0 : vector<32x32xf32>
    %5 = arith.mulf %2, %2 : vector<32x32xf32>
    %6 = arith.mulf %4, %4 : vector<32x32xf32>
    %7 = vector.shape_cast %5 : vector<32x32xf32> to vector<1x32x32xf32>
    %cst = arith.constant dense<0.000000e+00> : vector<1xf32>
    %8 = vector.multi_reduction <add>, %7, %cst [1, 2] : vector<1x32x32xf32> to vector<1xf32>
    %9 = vector.shape_cast %8 : vector<1xf32> to vector<1x1x1xf32>
    %10 = vector.extract %9[0, 0, 0] : f32 from vector<1x1x1xf32>
    %11 = vector.shape_cast %6 : vector<32x32xf32> to vector<1x32x32xf32>
    %cst_5 = arith.constant dense<0.000000e+00> : vector<1xf32>
    %12 = vector.multi_reduction <add>, %11, %cst_5 [1, 2] : vector<1x32x32xf32> to vector<1xf32>
    %13 = vector.shape_cast %12 : vector<1xf32> to vector<1x1x1xf32>
    %14 = vector.extract %13[0, 0, 0] : f32 from vector<1x1x1xf32>
    %15 = tpu.iota {dimensions = array<i32: 2>} : vector<1x8x128xi32>
    %c0_i32 = arith.constant 0 : i32
    %16 = vector.broadcast %c0_i32 : i32 to vector<1x8x128xi32>
    %17 = arith.cmpi eq, %15, %16 : vector<1x8x128xi32>
    %c1_i32 = arith.constant 1 : i32
    %18 = vector.broadcast %c1_i32 : i32 to vector<1x8x128xi32>
    %19 = arith.cmpi eq, %15, %18 : vector<1x8x128xi32>
    %cst_6 = arith.constant 0.000000e+00 : f32
    %20 = vector.broadcast %14 : f32 to vector<1x8x128xf32>
    %21 = vector.broadcast %cst_6 : f32 to vector<1x8x128xf32>
    %22 = arith.select %19, %20, %21 : vector<1x8x128xi1>, vector<1x8x128xf32>
    %23 = vector.broadcast %10 : f32 to vector<1x8x128xf32>
    %24 = arith.select %17, %23, %22 : vector<1x8x128xi1>, vector<1x8x128xf32>
    %c0_7 = arith.constant 0 : index
    %c0_8 = arith.constant 0 : index
    %c0_9 = arith.constant 0 : index
    %25 = vector.load %arg4[%c0_7, %c0_8, %c0_9] : memref<1x8x128xf32, #tpu.memory_space<vmem>>, vector<1x8x128xf32>
    tpu.vector_store %arg4[%c0_7, %c0_8, %c0_9], %24 {strides = array<i32>} : memref<1x8x128xf32, #tpu.memory_space<vmem>>, vector<1x8x128xf32>,
    return
  }
  func.func @transform_0(%arg0: i32) -> (i32, i32) {
    %c0_i32 = arith.constant 0 : i32
    %c0_i32_0 = arith.constant 0 : i32
    return %arg0, %c0_i32 : i32, i32
  }
  func.func @transform_1(%arg0: i32) -> (i32, i32) {
    %c0_i32 = arith.constant 0 : i32
    %c0_i32_0 = arith.constant 0 : i32
    return %arg0, %c0_i32 : i32, i32
  }
  func.func @transform_2(%arg0: i32) -> (i32, i32) {
    %c0_i32 = arith.constant 0 : i32
    %c0_i32_0 = arith.constant 0 : i32
    return %arg0, %c0_i32 : i32, i32
  }
  func.func @transform_3(%arg0: i32) -> (i32, i32, i32) {
    %c0_i32 = arith.constant 0 : i32
    %c0_i32_0 = arith.constant 0 : i32
    %c0_i32_1 = arith.constant 0 : i32
    return %arg0, %c0_i32, %c0_i32_0 : i32, i32, i32
  }
}

module attributes {stable_mosaic.version = 11 : i64} {
  func.func @_small_terms_kernel(%arg0: memref<2x8xf32, #tpu.memory_space<vmem>>, %arg1: memref<2x8xf32, #tpu.memory_space<vmem>>, %arg2: memref<2x16xf32, #tpu.memory_space<vmem>>, %arg3: memref<2x16xf32, #tpu.memory_space<vmem>>, %arg4: memref<2x16xf32, #tpu.memory_space<vmem>>, %arg5: memref<2x16xf32, #tpu.memory_space<vmem>>, %arg6: memref<8x128xf32, #tpu.memory_space<vmem>>) attributes {dimension_semantics = [], scalar_prefetch = 0 : i64, scratch_operands = 0 : i64, tpu.core_type = #tpu.core_type<tc>} {
    %c0 = arith.constant 0 : index
    %c0_0 = arith.constant 0 : index
    %0 = vector.load %arg0[%c0, %c0_0] : memref<2x8xf32, #tpu.memory_space<vmem>>, vector<2x8xf32>
    %c0_1 = arith.constant 0 : index
    %c0_2 = arith.constant 0 : index
    %1 = vector.load %arg1[%c0_1, %c0_2] : memref<2x8xf32, #tpu.memory_space<vmem>>, vector<2x8xf32>
    %2 = arith.subf %0, %1 : vector<2x8xf32>
    %cst = arith.constant 1.000000e-01 : f32
    %3 = vector.broadcast %cst : f32 to vector<2x8xf32>
    %4 = arith.mulf %2, %3 : vector<2x8xf32>
    %5 = arith.mulf %4, %4 : vector<2x8xf32>
    %6 = vector.shape_cast %5 : vector<2x8xf32> to vector<1x2x8xf32>
    %cst_3 = arith.constant dense<0.000000e+00> : vector<1xf32>
    %7 = vector.multi_reduction <add>, %6, %cst_3 [1, 2] : vector<1x2x8xf32> to vector<1xf32>
    %8 = vector.shape_cast %7 : vector<1xf32> to vector<1x1x1xf32>
    %9 = vector.extract %8[0, 0, 0] : f32 from vector<1x1x1xf32>
    %c0_4 = arith.constant 0 : index
    %c0_5 = arith.constant 0 : index
    %10 = vector.load %arg2[%c0_4, %c0_5] : memref<2x16xf32, #tpu.memory_space<vmem>>, vector<2x16xf32>
    %c0_6 = arith.constant 0 : index
    %c0_7 = arith.constant 0 : index
    %11 = vector.load %arg3[%c0_6, %c0_7] : memref<2x16xf32, #tpu.memory_space<vmem>>, vector<2x16xf32>
    %12 = arith.subf %10, %11 : vector<2x16xf32>
    %13 = arith.mulf %12, %12 : vector<2x16xf32>
    %14 = vector.shape_cast %13 : vector<2x16xf32> to vector<1x2x16xf32>
    %cst_8 = arith.constant dense<0.000000e+00> : vector<1xf32>
    %15 = vector.multi_reduction <add>, %14, %cst_8 [1, 2] : vector<1x2x16xf32> to vector<1xf32>
    %16 = vector.shape_cast %15 : vector<1xf32> to vector<1x1x1xf32>
    %17 = vector.extract %16[0, 0, 0] : f32 from vector<1x1x1xf32>
    %c0_9 = arith.constant 0 : index
    %c0_10 = arith.constant 0 : index
    %18 = vector.load %arg4[%c0_9, %c0_10] : memref<2x16xf32, #tpu.memory_space<vmem>>, vector<2x16xf32>
    %c0_11 = arith.constant 0 : index
    %c0_12 = arith.constant 0 : index
    %19 = vector.load %arg5[%c0_11, %c0_12] : memref<2x16xf32, #tpu.memory_space<vmem>>, vector<2x16xf32>
    %cst_13 = arith.constant 0.000000e+00 : f32
    %20 = vector.broadcast %cst_13 : f32 to vector<2x16xf32>
    %21 = arith.maximumf %18, %20 : vector<2x16xf32>
    %22 = arith.mulf %18, %19 : vector<2x16xf32>
    %23 = arith.subf %21, %22 : vector<2x16xf32>
    %24 = math.absf %18 : vector<2x16xf32>
    %cst_14 = arith.constant 0.000000e+00 : f32
    %25 = vector.broadcast %cst_14 : f32 to vector<2x16xf32>
    %26 = arith.subf %25, %24 : vector<2x16xf32>
    %27 = math.exp %26 : vector<2x16xf32>
    %cst_15 = arith.constant 1.000000e+00 : f32
    %28 = vector.broadcast %cst_15 : f32 to vector<2x16xf32>
    %29 = arith.addf %28, %27 : vector<2x16xf32>
    %cst_16 = arith.constant 1.000000e+00 : f32
    %30 = vector.broadcast %cst_16 : f32 to vector<2x16xf32>
    %31 = arith.subf %29, %30 : vector<2x16xf32>
    %cst_17 = arith.constant 0.000000e+00 : f32
    %32 = vector.broadcast %cst_17 : f32 to vector<2x16xf32>
    %33 = arith.cmpf oeq, %31, %32 : vector<2x16xf32>
    %cst_18 = arith.constant 1.000000e+00 : f32
    %34 = vector.broadcast %cst_18 : f32 to vector<2x16xf32>
    %35 = arith.select %33, %34, %31 : vector<2x16xi1>, vector<2x16xf32>
    %cst_19 = arith.constant 0.000000e+00 : f32
    %36 = vector.broadcast %cst_19 : f32 to vector<2x16xf32>
    %37 = arith.cmpf oeq, %31, %36 : vector<2x16xf32>
    %38 = math.log %29 : vector<2x16xf32>
    %39 = arith.divf %27, %35 : vector<2x16xf32>
    %40 = arith.mulf %38, %39 : vector<2x16xf32>
    %41 = arith.select %37, %27, %40 : vector<2x16xi1>, vector<2x16xf32>
    %42 = arith.addf %23, %41 : vector<2x16xf32>
    %43 = vector.shape_cast %42 : vector<2x16xf32> to vector<1x2x16xf32>
    %cst_20 = arith.constant dense<0.000000e+00> : vector<1xf32>
    %44 = vector.multi_reduction <add>, %43, %cst_20 [1, 2] : vector<1x2x16xf32> to vector<1xf32>
    %45 = vector.shape_cast %44 : vector<1xf32> to vector<1x1x1xf32>
    %46 = vector.extract %45[0, 0, 0] : f32 from vector<1x1x1xf32>
    %47 = tpu.iota {dimensions = array<i32: 1>} : vector<8x128xi32>
    %c0_i32 = arith.constant 0 : i32
    %48 = vector.broadcast %c0_i32 : i32 to vector<8x128xi32>
    %49 = arith.cmpi eq, %47, %48 : vector<8x128xi32>
    %cst_21 = arith.constant 0.000000e+00 : f32
    %50 = vector.broadcast %9 : f32 to vector<8x128xf32>
    %51 = vector.broadcast %cst_21 : f32 to vector<8x128xf32>
    %52 = arith.select %49, %50, %51 : vector<8x128xi1>, vector<8x128xf32>
    %c1_i32 = arith.constant 1 : i32
    %53 = vector.broadcast %c1_i32 : i32 to vector<8x128xi32>
    %54 = arith.cmpi eq, %47, %53 : vector<8x128xi32>
    %cst_22 = arith.constant 0.000000e+00 : f32
    %55 = vector.broadcast %17 : f32 to vector<8x128xf32>
    %56 = vector.broadcast %cst_22 : f32 to vector<8x128xf32>
    %57 = arith.select %54, %55, %56 : vector<8x128xi1>, vector<8x128xf32>
    %58 = arith.addf %52, %57 : vector<8x128xf32>
    %c2_i32 = arith.constant 2 : i32
    %59 = vector.broadcast %c2_i32 : i32 to vector<8x128xi32>
    %60 = arith.cmpi eq, %47, %59 : vector<8x128xi32>
    %cst_23 = arith.constant 0.000000e+00 : f32
    %61 = vector.broadcast %46 : f32 to vector<8x128xf32>
    %62 = vector.broadcast %cst_23 : f32 to vector<8x128xf32>
    %63 = arith.select %60, %61, %62 : vector<8x128xi1>, vector<8x128xf32>
    %64 = arith.addf %58, %63 : vector<8x128xf32>
    %c0_24 = arith.constant 0 : index
    %c0_25 = arith.constant 0 : index
    %65 = vector.load %arg6[%c0_24, %c0_25] : memref<8x128xf32, #tpu.memory_space<vmem>>, vector<8x128xf32>
    tpu.vector_store %arg6[%c0_24, %c0_25], %64 {strides = array<i32>} : memref<8x128xf32, #tpu.memory_space<vmem>>, vector<8x128xf32>,
    return
  }
}

</mosaic_0001>

<bundles_post_ra>
// kernel: dnn_loss.3
= control target key start
LH: loop header
LB: loop body
LE: loop exit
PB: predicated region body
PF: predicated region fallthrough
CT: control target
= control target key end

     0   :  { %vm28_vm0 = vcmask 58368   ;;  %vm43_vm1 = vcmask 123904   ;;  %v84_v52 = vlaneseq  ;;  %s173_s0 = inlined_call_operand.vmem [shape: f32[2,8], index: 0, kind: input, shape index: {}]   ;;  %s174_s1 = inlined_call_operand.vmem [shape: f32[2,8], index: 1, kind: input, shape index: {}]   ;;  %s175_s2 = inlined_call_operand.vmem [shape: f32[2,16], index: 2, kind: input, shape index: {}]   ;;  %s176_s3 = inlined_call_operand.vmem [shape: f32[2,16], index: 3, kind: input, shape index: {}]   ;;  %s177_s4 = inlined_call_operand.vmem [shape: f32[2,16], index: 4, kind: input, shape index: {}]   ;;  %s178_s5 = inlined_call_operand.vmem [shape: f32[2,16], index: 5, kind: input, shape index: {}]   ;;  %s179_s6 = inlined_call_operand.vmem [shape: f32[8,128], index: 6, kind: output, shape index: {}]  }
   0x1   :  { %v23_v0 = vld [vmem:[%s173_s0] sm:$0x3] }
   0x2   :  { %v24_v1 = vld [vmem:[%s174_s1] sm:$0x3]  ;;  %v85_v53 = vand.u32 127, %v84_v52 }
   0x3   :  { %v39_v2 = vld [vmem:[%s175_s2] sm:$0x3]  ;;  %v25_v3 = vsub.f32 %v23_v0, %v24_v1 }
   0x4   :  { %v40_v4 = vld [vmem:[%s176_s3] sm:$0x3]  ;;  %vm86_vm3 = vcmp.eq.s32.totalorder %v85_v53, 0  ;;  %vm89_vm4 = vcmp.eq.s32.totalorder %v85_v53, 1  ;;  %vm93_vm5 = vcmp.eq.s32.totalorder %v85_v53, 2 }
   0x5   :  { %v54_v5 = vld [vmem:[%s177_s4] sm:$0x3]  ;;  %v41_v6 = vsub.f32 %v39_v2, %v40_v4  ;;  %v26_v8 = vmul.f32 0.1, %v25_v3 }
   0x6   :  { %v59_v7 = vand.u32 2147483647, %v54_v5  ;;  %v55_v19 = vld [vmem:[%s178_s5] sm:$0x3]  ;;  %v56_v21 = vmax.f32 %v54_v5, 0.0 }
   0x7   :  { %v27_v10 = vmul.f32 %v26_v8, %v26_v8  ;;  %v42_v11 = vmul.f32 %v41_v6, %v41_v6  ;;  %v57_v22 = vmul.f32 %v55_v19, %v54_v5 }
   0x8   :  { %v60_v9 = vsub.f32 0.0, %v59_v7 }
   0x9   :  { %v29_v13 = vsel %vm28_vm0, %v27_v10, 0.0  ;;  %v44_v14 = vsel %vm43_vm1, %v42_v11, 0.0  ;;  %v58_v26 = vsub.f32 %v56_v21, %v57_v22 }
   0xa   :  { %v61_v12 = vmul.f32 1.442695, %v60_v9  ;;  %30 = vadd.xlane.f32.xlu0 %v29_v13 }
   0xc   :  { %109 = vpow2.f32 %v61_v12 }
   0xe   :  { %45 = vadd.xlane.f32.xlu0 %v44_v14 }
  0x16   :  { %v110_v15 = vpop.eup %109 }
  0x17   :  { %v63_v16 = vadd.f32 1.0, %v110_v15 }
  0x19   :  { %v102_v17 = vadd.f32 -1.0, %v63_v16  ;;  %111 = vlog2.f32 %v63_v16 }
  0x1b   :  { %vm65_vm2 = vcmp.eq.f32.partialorder %v102_v17, 0.0 }
  0x1c   :  { %v66_v18 = vsel %vm65_vm2, 1.0, %v102_v17 }
  0x1d   :  { %113 = vrcp.f32 %v66_v18 }
  0x23   :  { %v112_v20 = vpop.eup %111 }
  0x24   :  { %v68_v23 = vmul.f32 0.6931472, %v112_v20 }
  0x27   :  { %v114_v24 = vpop.eup %113 }
  0x28   :  { %v70_v25 = vmul.f32 %v114_v24, %v110_v15 }
  0x2a   :  { %v71_v27 = vmul.f32 %v70_v25, %v68_v23 }
  0x2c   :  { %v72_v28 = vsel %vm65_vm2, %v110_v15, %v71_v27 }
  0x2d   :  { %v73_v29 = vadd.f32 %v72_v28, %v58_v26 }
  0x2f   :  { %v74_v30 = vsel %vm43_vm1, %v73_v29, 0.0 }
  0x30   :  { %75 = vadd.xlane.f32.xlu1 %v74_v30 }
  0x97   :  { %v31_v31 = vpop.xlane.xlu0 %30 }
  0x98   :  { %v32_v32 = vrot.slane %v31_v31, 4 }
  0x9a   :  { %v33_v33 = vadd.f32 %v32_v32, %v31_v31 }
  0x9b   :  { %v46_v34 = vpop.xlane.xlu0 %45 }
  0x9c   :  { %v34_v35 = vrot.slane %v33_v33, 2  ;;  %v47_v36 = vrot.slane %v46_v34, 4 }
  0x9e   :  { %v48_v37 = vadd.f32 %v47_v36, %v46_v34  ;;  %v35_v38 = vadd.f32 %v34_v35, %v33_v33 }
  0xa0   :  { %v49_v39 = vrot.slane %v48_v37, 2  ;;  %v36_v40 = vrot.slane %v35_v38, 1 }
  0xa2   :  { %v50_v41 = vadd.f32 %v49_v39, %v48_v37  ;;  %v37_v42 = vadd.f32 %v36_v40, %v35_v38 }
  0xa4   :  { %103 = vpush %v37_v42  ;;  %v51_v43 = vrot.slane %v50_v41, 1 }
  0xa6   :  { %v52_v44 = vadd.f32 %v51_v43, %v50_v41 }
  0xa8   :  { %105 = vpush %v52_v44 }
  0xbd   :  { %v76_v45 = vpop.xlane.xlu1 %75 }
  0xbe   :  { %v77_v46 = vrot.slane %v76_v45, 4 }
  0xc0   :  { %v78_v47 = vadd.f32 %v77_v46, %v76_v45 }
  0xc2   :  { %v79_v48 = vrot.slane %v78_v47, 2 }
  0xc4   :  { %v80_v49 = vadd.f32 %v79_v48, %v78_v47 }
  0xc6   :  { %v81_v50 = vrot.slane %v80_v49, 1 }
  0xc8   :  { %v82_v51 = vadd.f32 %v81_v50, %v80_v49 }
  0xca   :  { %107 = vpush %v82_v51 }
  0xd5   :  { %s104_s2 = spop %103 }
  0xd6   :  { %v87_v54 = vstv %s104_s2 }
  0xd7   :  { %v88_v56 = vsel %vm86_vm3, %v87_v54, 0.0 }
  0xd9   :  { %s106_s3 = spop %105 }
  0xda   :  { %v90_v55 = vstv %s106_s3 }
  0xdb   :  { %v91_v57 = vsel %vm89_vm4, %v90_v55, 0.0 }
  0xdc   :  { %v92_v58 = vadd.f32 %v91_v57, %v88_v56 }
  0xfb   :  { %s108_s4 = spop %107 }
  0xfc   :  { %v94_v59 = vstv %s108_s4 }
  0xfd   :  { %v95_v60 = vsel %vm93_vm5, %v94_v59, 0.0 }
  0xfe   :  { %v96_v61 = vadd.f32 %v95_v60, %v92_v58 }
 0x100   :  { %97 = vst [vmem:[%s179_s6] sm:$0xff] %v96_v61 }

// kernel: dnn_loss.2
= control target key start
LH: loop header
LB: loop body
LE: loop exit
PB: predicated region body
PF: predicated region fallthrough
CT: control target
= control target key end

     0   :  { %vm42_vm0 = vcmask 261120   ;;  %v75_v56 = vlaneseq  ;;  %s159_s0 = inlined_call_operand.vmem [shape: f32[32,32], index: 0, kind: input, shape index: {}]   ;;  %s160_s2 = inlined_call_operand.vmem [shape: f32[32,32], index: 2, kind: input, shape index: {}]   ;;  %s161_s1 = inlined_call_operand.vmem [shape: f32[32,32], index: 1, kind: input, shape index: {}]   ;;  %s162_s3 = inlined_call_operand.vmem [shape: f32[1,8,128], index: 3, kind: output, shape index: {}]  }
   0x1   :  { %v14_v0 = vld [vmem:[%s160_s2] sm:$0xff]  ;;  %v15_v1 = vld [vmem:[%s160_s2 + $0x8] sm:$0xff]  ;;  %v16_v2 = vld [vmem:[%s160_s2 + $0x10] sm:$0xff] }
   0x2   :  { %v17_v3 = vld [vmem:[%s160_s2 + $0x18] sm:$0xff]  ;;  %v18_v4 = vld [vmem:[%s159_s0] sm:$0xff]  ;;  %v19_v5 = vld [vmem:[%s159_s0 + $0x8] sm:$0xff]  ;;  %v76_v57 = vand.u32 127, %v75_v56 }
   0x3   :  { %v20_v6 = vld [vmem:[%s159_s0 + $0x10] sm:$0xff]  ;;  %v21_v7 = vld [vmem:[%s159_s0 + $0x18] sm:$0xff]  ;;  %v22_v8 = vsub.f32 %v18_v4, %v14_v0  ;;  %v23_v9 = vsub.f32 %v19_v5, %v15_v1  ;;  %v26_v10 = vld [vmem:[%s161_s1] sm:$0xff] }
   0x4   :  { %v24_v11 = vsub.f32 %v20_v6, %v16_v2  ;;  %v25_v12 = vsub.f32 %v21_v7, %v17_v3  ;;  %v27_v13 = vld [vmem:[%s161_s1 + $0x8] sm:$0xff]  ;;  %v28_v14 = vld [vmem:[%s161_s1 + $0x10] sm:$0xff]  ;;  %v29_v15 = vld [vmem:[%s161_s1 + $0x18] sm:$0xff]  ;;  %v30_v16 = vsub.f32 %v26_v10, %v14_v0  ;;  %vm78_vm1 = vcmp.eq.s32.totalorder %v76_v57, 1 }
   0x5   :  { %v34_v17 = vmul.f32 %v22_v8, %v22_v8  ;;  %v35_v18 = vmul.f32 %v23_v9, %v23_v9  ;;  %v31_v19 = vsub.f32 %v27_v13, %v15_v1  ;;  %v32_v20 = vsub.f32 %v28_v14, %v16_v2 }
   0x6   :  { %v36_v21 = vmul.f32 %v24_v11, %v24_v11  ;;  %v37_v22 = vmul.f32 %v25_v12, %v25_v12  ;;  %v33_v23 = vsub.f32 %v29_v15, %v17_v3  ;;  %v38_v24 = vmul.f32 %v30_v16, %v30_v16 }
   0x7   :  { %v43_v25 = vsel %vm42_vm0, %v34_v17, 0.0  ;;  %v44_v26 = vsel %vm42_vm0, %v35_v18, 0.0  ;;  %v39_v27 = vmul.f32 %v31_v19, %v31_v19  ;;  %v40_v28 = vmul.f32 %v32_v20, %v32_v20 }
   0x8   :  { %v45_v29 = vadd.f32 %v44_v26, %v43_v25  ;;  %v46_v30 = vsel %vm42_vm0, %v36_v21, 0.0  ;;  %v41_v31 = vmul.f32 %v33_v23, %v33_v23  ;;  %v48_v32 = vsel %vm42_vm0, %v37_v22, 0.0 }
   0x9   :  { %v59_v33 = vsel %vm42_vm0, %v38_v24, 0.0  ;;  %v60_v34 = vsel %vm42_vm0, %v39_v27, 0.0  ;;  %v62_v35 = vsel %vm42_vm0, %v40_v28, 0.0  ;;  %vm77_vm2 = vcmp.eq.s32.totalorder %v76_v57, 0 }
   0xa   :  { %v47_v36 = vadd.f32 %v46_v30, %v45_v29  ;;  %v61_v37 = vadd.f32 %v60_v34, %v59_v33  ;;  %v64_v38 = vsel %vm42_vm0, %v41_v31, 0.0 }
   0xc   :  { %v49_v39 = vadd.f32 %v48_v32, %v47_v36  ;;  %v63_v40 = vadd.f32 %v62_v35, %v61_v37 }
   0xe   :  { %50 = vadd.xlane.f32.xlu0 %v49_v39  ;;  %v65_v41 = vadd.f32 %v64_v38, %v63_v40 }
  0x12   :  { %66 = vadd.xlane.f32.xlu0 %v65_v41 }
  0x9b   :  { %v51_v42 = vpop.xlane.xlu0 %50 }
  0x9c   :  { %v52_v43 = vrot.slane %v51_v42, 4 }
  0x9e   :  { %v53_v44 = vadd.f32 %v52_v43, %v51_v42 }
  0x9f   :  { %v67_v45 = vpop.xlane.xlu0 %66 }
  0xa0   :  { %v54_v46 = vrot.slane %v53_v44, 2  ;;  %v68_v47 = vrot.slane %v67_v45, 4 }
  0xa2   :  { %v69_v48 = vadd.f32 %v68_v47, %v67_v45  ;;  %v55_v49 = vadd.f32 %v54_v46, %v53_v44 }
  0xa4   :  { %v70_v50 = vrot.slane %v69_v48, 2  ;;  %v56_v51 = vrot.slane %v55_v49, 1 }
  0xa6   :  { %v71_v52 = vadd.f32 %v70_v50, %v69_v48  ;;  %v57_v53 = vadd.f32 %v56_v51, %v55_v49 }
  0xa8   :  { %88 = vpush %v57_v53  ;;  %v72_v54 = vrot.slane %v71_v52, 1 }
  0xaa   :  { %v73_v55 = vadd.f32 %v72_v54, %v71_v52 }
  0xac   :  { %90 = vpush %v73_v55 }
  0xd9   :  { %s89_s0 = spop %88 }
  0xda   :  { %v81_v59 = vstv %s89_s0 }
  0xdd   :  { %s91_s1 = spop %90 }
  0xde   :  { %v79_v58 = vstv %s91_s1 }
  0xdf   :  { %v80_v60 = vsel %vm78_vm1, %v79_v58, 0.0 }
  0xe0   :  { %v82_v61 = vsel %vm77_vm2, %v81_v59, %v80_v60 }
  0xe1   :  { %83 = vst [vmem:[%s162_s3] sm:$0xff] %v82_v61 }

</bundles_post_ra>
